<compile_context>
chip_gen: v7x
topology: tpu7x:2x2x1
jax: 0.10.0
libtpu: 0.0.40
codegen_flags: <defaults>
</compile_context>

<pallas_src>
import functools

import jax
import jax.numpy as jnp
from jax import lax
from jax.experimental import pallas as pl
from jax.experimental.pallas import tpu as pltpu


def _cls_head_kernel(x_ref, w1_ref, b1_ref, w2_ref, o_ref, acc_ref):
    # x_ref:  (bt, H)   resident CLS-token activations
    # w1_ref: (tn, H)   contiguous row slab of dense.weight (PyTorch (out,in))
    # b1_ref: (1, tn)   matching dense.bias slice (f32)
    # w2_ref: (L, tn)   matching out_proj.weight columns (PyTorch (out,in))
    # o_ref:  (bt, L)   partial logits for this split (f32)
    # acc_ref:(bt, L)   f32 running logits for the current (split, batch) group
    j = pl.program_id(2)

    @pl.when(j == 0)
    def _init():
        acc_ref[...] = jnp.zeros_like(acc_ref)

    # h_j = tanh(x @ W1[rows_j, :].T + b1[rows_j])          -> (bt, tn)
    # Contract x's last dim with W1's last dim (in_features): no transpose
    # copy of the dominant H x H weight.  Dropout is identity at inference.
    # TODO(synk): training-mode dropout (pltpu.prng_random_bits mask) not implemented.
    h = jnp.tanh(
        lax.dot_general(x_ref[...], w1_ref[...],
                        dimension_numbers=(((1,), (1,)), ((), ())),
                        preferred_element_type=jnp.float32)
        + b1_ref[...])

    # Partial logits: h_j @ W2[:, rows_j].T                 -> (bt, L)
    acc_ref[...] += lax.dot_general(
        h.astype(w2_ref.dtype), w2_ref[...],
        dimension_numbers=(((1,), (1,)), ((), ())),
        preferred_element_type=jnp.float32)

    @pl.when(j == pl.num_programs(2) - 1)
    def _finalize():
        o_ref[...] = acc_ref[...]


def _vmem_capacity_bytes():
    try:
        return int(pltpu.get_tpu_info().vmem_capacity_bytes)
    except Exception:
        return 64 << 20   # conservative: v7x per-TensorCore VMEM


def _pick_bt(B, max_rows):
    """Largest batch tile; target nb == 1 so W1 streams from HBM exactly once."""
    if B <= max_rows:
        return B
    best = 8
    for bt in range(8, int(max_rows) + 1, 8):   # sublane-aligned divisors
        if B % bt == 0:
            best = bt
    return best


@functools.partial(jax.jit, static_argnames=("param_dtype", "max_block_n"))
def longformer_classification_head(hidden_states, dense_w, dense_b,
                                   out_proj_w, out_proj_b, *,
                                   param_dtype=None, max_block_n=None):
    """Fused Longformer classification head (eval mode).

    hidden_states: (B, S, H)
    dense_w:    (H, H)  PyTorch (out, in) layout;   dense_b: (H,)
    out_proj_w: (L, H)  PyTorch (out, in) layout;   out_proj_b: (L,)
    param_dtype: recommended jnp.bfloat16 for deployment — halves the HBM
                 weight stream (the kernel is HBM-bound on the H x H weight);
                 accumulation stays f32.  Default None keeps exact f32 math.
    max_block_n: optional cap on the W1 row-slab size (tuning / test knob).
    Returns logits (B, L) in hidden_states.dtype.
    """
    B, _, H = hidden_states.shape
    L = out_proj_w.shape[0]
    out_dtype = hidden_states.dtype

    # Glue only (B*H << H*H): CLS slice + f32 bias row.
    x = hidden_states[:, 0, :]
    if param_dtype is not None:
        x = x.astype(param_dtype)
        dense_w = dense_w.astype(param_dtype)
        out_proj_w = out_proj_w.astype(param_dtype)
    itemsize = jnp.dtype(x.dtype).itemsize
    b1 = dense_b.reshape(1, H).astype(jnp.float32)

    cap = _vmem_capacity_bytes()
    budget = cap // 2                      # leave headroom for Mosaic internals

    # Batch tile: whole batch resident if it fits (quarter of the budget max).
    bt = _pick_bt(B, max(8, (budget // 4) // (2 * H * itemsize)))
    nb = pl.cdiv(B, bt)

    # Two-way split of the dense output (N = H) dimension: engages both v7x
    # TensorCores without duplicating the W1 stream; near-free on v5e/v6e.
    nsplit = 2 if H % 256 == 0 else 1
    Hs = H // nsplit

    def _bytes(tn):
        return (2 * bt * H * itemsize      # resident x (double-buffered)
                + 2 * tn * H * itemsize    # W1 row-slab stream
                + 2 * tn * 4               # b1 slices (f32)
                + 2 * L * tn * itemsize    # W2 column stream
                + 2 * bt * L * 4           # output blocks
                + bt * L * 4)              # accumulator scratch

    # N tile: largest 128-aligned divisor of Hs whose blocks fit the budget.
    tn = Hs
    if Hs % 128 == 0:
        cands = [c for c in (4096, 2048, 1024, 512, 256, 128)
                 if c <= Hs and Hs % c == 0]
        if max_block_n is not None:
            cands = [c for c in cands if c <= max_block_n] or [128]
        for c in cands:
            if _bytes(c) <= budget:
                tn = c
                break
        else:
            tn = cands[-1]
    nj = Hs // tn

    vmem_limit = int(min(max(int(1.5 * _bytes(tn)), 32 << 20), int(cap * 0.9)))

    partial = pl.pallas_call(
        _cls_head_kernel,
        out_shape=jax.ShapeDtypeStruct((nsplit, B, L), jnp.float32),
        grid_spec=pltpu.PrefetchScalarGridSpec(
            num_scalar_prefetch=0,
            grid=(nsplit, nb, nj),
            in_specs=[
                pl.BlockSpec((bt, H), lambda c, b, j: (b, 0)),                 # x
                pl.BlockSpec((tn, H), lambda c, b, j, nj=nj: (c * nj + j, 0)),  # W1
                pl.BlockSpec((1, tn), lambda c, b, j, nj=nj: (0, c * nj + j)),  # b1
                pl.BlockSpec((L, tn), lambda c, b, j, nj=nj: (0, c * nj + j)),  # W2
            ],
            out_specs=pl.BlockSpec((None, bt, L), lambda c, b, j: (c, b, 0)),
            scratch_shapes=[pltpu.VMEM((bt, L), jnp.float32)],
        ),
        compiler_params=pltpu.CompilerParams(
            dimension_semantics=("parallel", "parallel", "arbitrary"),
            vmem_limit_bytes=vmem_limit),
    )(x, dense_w, b1, out_proj_w)

    logits = partial.sum(axis=0) + out_proj_b.astype(jnp.float32)
    return logits.astype(out_dtype)


def _reference(hidden_states, dense_w, dense_b, out_proj_w, out_proj_b):
    x = hidden_states[:, 0, :]
    h = jnp.tanh(x @ dense_w.T + dense_b)
    return h @ out_proj_w.T + out_proj_b


if __name__ == "__main__":
    key = jax.random.PRNGKey(0)

    # --- Config 1: module-sized shapes (batch=2, seq=8, hidden=32, labels=4),
    #     single N block, exact f32 check.
    B, S, H, L = 2, 8, 32, 4
    k_x, k_w1, k_b1, k_w2, k_b2, k_rest = jax.random.split(key, 6)
    hidden_states = jax.random.normal(k_x, (B, S, H), dtype=jnp.float32)
    dense_w = jax.random.normal(k_w1, (H, H), dtype=jnp.float32) * 0.02
    dense_b = jax.random.normal(k_b1, (H,), dtype=jnp.float32) * 0.02
    out_proj_w = jax.random.normal(k_w2, (L, H), dtype=jnp.float32) * 0.02
    out_proj_b = jax.random.normal(k_b2, (L,), dtype=jnp.float32) * 0.02

    logits = longformer_classification_head(
        hidden_states, dense_w, dense_b, out_proj_w, out_proj_b)
    logits = jax.block_until_ready(logits)
    ref = _reference(hidden_states, dense_w, dense_b, out_proj_w, out_proj_b)
    assert logits.shape == (B, L)
    assert jnp.allclose(logits, ref, atol=1e-5, rtol=1e-5)

    # --- Config 2: exercises the N-tiled logits accumulation path
    #     (H=640 -> tn=128, 5 N-steps; nsplit=1).  Exact f32 check.
    B2, S2, H2, L2 = 8, 4, 640, 4
    kk = jax.random.split(k_rest, 10)
    hs2 = jax.random.normal(kk[0], (B2, S2, H2), dtype=jnp.float32)
    dw2 = jax.random.normal(kk[1], (H2, H2), dtype=jnp.float32) * 0.02
    db2 = jax.random.normal(kk[2], (H2,), dtype=jnp.float32) * 0.02
    ow2 = jax.random.normal(kk[3], (L2, H2), dtype=jnp.float32) * 0.02
    ob2 = jax.random.normal(kk[4], (L2,), dtype=jnp.float32) * 0.02

    logits2 = longformer_classification_head(hs2, dw2, db2, ow2, ob2,
                                              max_block_n=128)
    logits2 = jax.block_until_ready(logits2)
    ref2 = _reference(hs2, dw2, db2, ow2, ob2)
    assert logits2.shape == (B2, L2)
    assert jnp.allclose(logits2, ref2, atol=1e-4, rtol=1e-4)

    # --- Config 3: recommended deployment path — bf16 weight stream + the
    #     two-way N split (H=512 -> nsplit=2, tn=128, 2 N-steps per split).
    B3, S3, H3, L3 = 4, 4, 512, 4
    hs3 = jax.random.normal(kk[5], (B3, S3, H3), dtype=jnp.float32)
    dw3 = jax.random.normal(kk[6], (H3, H3), dtype=jnp.float32) * 0.02
    db3 = jax.random.normal(kk[7], (H3,), dtype=jnp.float32) * 0.02
    ow3 = jax.random.normal(kk[8], (L3, H3), dtype=jnp.float32) * 0.02
    ob3 = jax.random.normal(kk[9], (L3,), dtype=jnp.float32) * 0.02

    logits3 = longformer_classification_head(hs3, dw3, db3, ow3, ob3,
                                              param_dtype=jnp.bfloat16,
                                              max_block_n=128)
    logits3 = jax.block_until_ready(logits3)
    ref3 = _reference(hs3, dw3, db3, ow3, ob3)
    assert logits3.shape == (B3, L3)
    assert jnp.allclose(logits3, ref3, atol=5e-2, rtol=5e-2)

    print("KERNEL_OK")
</pallas_src>

<mosaic_0001>
module attributes {stable_mosaic.version = 11 : i64} {
  func.func @_cls_head_kernel(%arg0: i32, %arg1: i32, %arg2: i32, %arg3: memref<2x32xf32, #tpu.memory_space<vmem>>, %arg4: memref<32x32xf32, #tpu.memory_space<vmem>>, %arg5: memref<1x32xf32, #tpu.memory_space<vmem>>, %arg6: memref<4x32xf32, #tpu.memory_space<vmem>>, %arg7: memref<1x2x4xf32, #tpu.memory_space<vmem>>, %arg8: memref<2x4xf32, #tpu.memory_space<vmem>>) attributes {dimension_semantics = [#tpu.dimension_semantics<parallel>, #tpu.dimension_semantics<parallel>, #tpu.dimension_semantics<arbitrary>], iteration_bounds = array<i64: 1, 1, 1>, scalar_prefetch = 0 : i64, scratch_operands = 1 : i64, tpu.core_type = #tpu.core_type<tc>, window_params = [{transform_indices = @transform_0, window_bounds = array<i64: 2, 32>}, {transform_indices = @transform_1, window_bounds = array<i64: 32, 32>}, {transform_indices = @transform_2, window_bounds = array<i64: 1, 32>}, {transform_indices = @transform_3, window_bounds = array<i64: 4, 32>}, {transform_indices = @transform_4, window_bounds = array<i64: 1, 2, 4>}]} {
    %c0_i32 = arith.constant 0 : i32
    %0 = arith.cmpi eq, %arg2, %c0_i32 : i32
    %1 = arith.extui %0 : i1 to i32
    %c0_i32_0 = arith.constant 0 : i32
    %2 = arith.cmpi ne, %1, %c0_i32_0 : i32
    scf.if %2 {
      %cst_15 = arith.constant 0.000000e+00 : f32
      %18 = vector.broadcast %cst_15 : f32 to vector<2x4xf32>
      %c0_16 = arith.constant 0 : index
      %c0_17 = arith.constant 0 : index
      %19 = vector.load %arg8[%c0_16, %c0_17] : memref<2x4xf32, #tpu.memory_space<vmem>>, vector<2x4xf32>
      tpu.vector_store %arg8[%c0_16, %c0_17], %18 {strides = array<i32>} : memref<2x4xf32, #tpu.memory_space<vmem>>, vector<2x4xf32>,
    } else {
    }
    %c0 = arith.constant 0 : index
    %c0_1 = arith.constant 0 : index
    %3 = vector.load %arg3[%c0, %c0_1] : memref<2x32xf32, #tpu.memory_space<vmem>>, vector<2x32xf32>
    %c0_2 = arith.constant 0 : index
    %c0_3 = arith.constant 0 : index
    %4 = vector.load %arg4[%c0_2, %c0_3] : memref<32x32xf32, #tpu.memory_space<vmem>>, vector<32x32xf32>
    %cst = arith.constant dense<0.000000e+00> : vector<2x32xf32>
    %5 = tpu.matmul %3, %4, %cst {dimension_numbers = #tpu.dot_dimension_numbers<[1], [1], [0], [0], [0, 0, 1, 0], [], []>} : vector<2x32xf32>, vector<32x32xf32>, vector<2x32xf32> -> vector<2x32xf32>
    %c0_4 = arith.constant 0 : index
    %c0_5 = arith.constant 0 : index
    %6 = vector.load %arg5[%c0_4, %c0_5] : memref<1x32xf32, #tpu.memory_space<vmem>>, vector<1x32xf32>
    %7 = vector.broadcast %6 : vector<1x32xf32> to vector<2x32xf32>
    %8 = arith.addf %5, %7 : vector<2x32xf32>
    %9 = math.tanh %8 : vector<2x32xf32>
    %c0_6 = arith.constant 0 : index
    %c0_7 = arith.constant 0 : index
    %10 = vector.load %arg8[%c0_6, %c0_7] : memref<2x4xf32, #tpu.memory_space<vmem>>, vector<2x4xf32>
    %c0_8 = arith.constant 0 : index
    %c0_9 = arith.constant 0 : index
    %11 = vector.load %arg6[%c0_8, %c0_9] : memref<4x32xf32, #tpu.memory_space<vmem>>, vector<4x32xf32>
    %cst_10 = arith.constant dense<0.000000e+00> : vector<2x4xf32>
    %12 = tpu.matmul %9, %11, %cst_10 {dimension_numbers = #tpu.dot_dimension_numbers<[1], [1], [0], [0], [0, 0, 1, 0], [], []>} : vector<2x32xf32>, vector<4x32xf32>, vector<2x4xf32> -> vector<2x4xf32>
    %13 = arith.addf %10, %12 : vector<2x4xf32>
    %c0_11 = arith.constant 0 : index
    %c0_12 = arith.constant 0 : index
    %14 = vector.load %arg8[%c0_11, %c0_12] : memref<2x4xf32, #tpu.memory_space<vmem>>, vector<2x4xf32>
    tpu.vector_store %arg8[%c0_11, %c0_12], %13 {strides = array<i32>} : memref<2x4xf32, #tpu.memory_space<vmem>>, vector<2x4xf32>,
    %c0_i32_13 = arith.constant 0 : i32
    %15 = arith.cmpi eq, %arg2, %c0_i32_13 : i32
    %16 = arith.extui %15 : i1 to i32
    %c0_i32_14 = arith.constant 0 : i32
    %17 = arith.cmpi ne, %16, %c0_i32_14 : i32
    scf.if %17 {
      %c0_15 = arith.constant 0 : index
      %c0_16 = arith.constant 0 : index
      %18 = vector.load %arg8[%c0_15, %c0_16] : memref<2x4xf32, #tpu.memory_space<vmem>>, vector<2x4xf32>
      %c0_17 = arith.constant 0 : index
      %c0_18 = arith.constant 0 : index
      %c0_19 = arith.constant 0 : index
      %19 = vector.load %arg7[%c0_17, %c0_18, %c0_19] : memref<1x2x4xf32, #tpu.memory_space<vmem>>, vector<1x2x4xf32>
      %20 = vector.shape_cast %19 : vector<1x2x4xf32> to vector<2x4xf32>
      %21 = vector.shape_cast %18 : vector<2x4xf32> to vector<1x2x4xf32>
      tpu.vector_store %arg7[%c0_17, %c0_18, %c0_19], %21 {strides = array<i32>} : memref<1x2x4xf32, #tpu.memory_space<vmem>>, vector<1x2x4xf32>,
    } else {
    }
    return
  }
  func.func @transform_0(%arg0: i32, %arg1: i32, %arg2: i32) -> (i32, i32) {
    %c0_i32 = arith.constant 0 : i32
    %c0_i32_0 = arith.constant 0 : i32
    return %arg1, %c0_i32 : i32, i32
  }
  func.func @transform_1(%arg0: i32, %arg1: i32, %arg2: i32) -> (i32, i32) {
    %c1_i32 = arith.constant 1 : i32
    %0 = arith.muli %arg0, %c1_i32 : i32
    %1 = arith.addi %0, %arg2 : i32
    %c0_i32 = arith.constant 0 : i32
    %c0_i32_0 = arith.constant 0 : i32
    return %1, %c0_i32 : i32, i32
  }
  func.func @transform_2(%arg0: i32, %arg1: i32, %arg2: i32) -> (i32, i32) {
    %c1_i32 = arith.constant 1 : i32
    %0 = arith.muli %arg0, %c1_i32 : i32
    %1 = arith.addi %0, %arg2 : i32
    %c0_i32 = arith.constant 0 : i32
    %c0_i32_0 = arith.constant 0 : i32
    return %c0_i32, %1 : i32, i32
  }
  func.func @transform_3(%arg0: i32, %arg1: i32, %arg2: i32) -> (i32, i32) {
    %c1_i32 = arith.constant 1 : i32
    %0 = arith.muli %arg0, %c1_i32 : i32
    %1 = arith.addi %0, %arg2 : i32
    %c0_i32 = arith.constant 0 : i32
    %c0_i32_0 = arith.constant 0 : i32
    return %c0_i32, %1 : i32, i32
  }
  func.func @transform_4(%arg0: i32, %arg1: i32, %arg2: i32) -> (i32, i32, i32) {
    %c0_i32 = arith.constant 0 : i32
    %c0_i32_0 = arith.constant 0 : i32
    return %arg0, %arg1, %c0_i32 : i32, i32, i32
  }
}

</mosaic_0001>

<bundles_post_ra>
// kernel: longformer_classification_head.1
= control target key start
LH: loop header
LB: loop body
LE: loop exit
PB: predicated region body
PF: predicated region fallthrough
CT: control target
= control target key end

     0   :  { %9 = vsyncpa [#allocation4], 0  ;;  %s344_s15 = smov [#allocation3]   ;;  %s407_s0 = inlined_call_operand.vmem [shape: f32[2,32], index: 0, kind: input, shape index: {}]   ;;  %s408_s1 = inlined_call_operand.hbm [shape: f32[32,32], index: 1, kind: input, shape index: {}]   ;;  %s409_s2 = inlined_call_operand.vmem [shape: f32[1,32], index: 2, kind: input, shape index: {}]   ;;  %s410_s3 = inlined_call_operand.vmem [shape: f32[4,32], index: 3, kind: input, shape index: {}]   ;;  %s411_s4 = inlined_call_operand.vmem [shape: f32[1,2,4], index: 4, kind: output, shape index: {}]  }
   0x1   :  { %s21_s16 = sshll.u32 %s344_s15, 4  ;;  %s320_s19 = scalar_lea.hbm %s408_s1, 512  ;;  %s22_s16 = int_to_ptr.vmem [resolvable:$true] %s21_s16 }
   0x2   :  { %p321_p0 = scmp.ne.s32.totalorder %s408_s1, %s320_s19  ;;  %p324_p1 = scmp.lt.u32.totalorder %s320_s19, %s408_s1 }
   0x4   :  { %p326_p2 = pnand %p324_p1, %p321_p0 }
   0x6   :  { %329 = shalt.err (!%p326_p2)
}
   0x7   :  { %s330_s24 = scalar_lea.vmem %s22_s16, 512  ;;  %p335_p4 = scmp.lt.s32.totalorder %s22_s16, %s22_s16 }
   0x8   :  { %p331_p3 = scmp.ne.s32.totalorder %s22_s16, %s330_s24  ;;  %p336_p5 = scmp.lt.s32.totalorder %s330_s24, %s330_s24 }
   0xa   :  { %p337_p6 = por %p336_p5, %p335_p4 }
   0xc   :  { %p338_p7 = pnand %p337_p6, %p331_p3 }
   0xe   :  { %341 = shalt.err (!%p338_p7)
}
   0xf   :  { %s345_s25 = smov 128   ;;  %s346_s26 = smov 8  }
  0x10   :  { %27 = dma.hbm_to_vmem [thread:$0]  %s408_s1, 512, %s22_s16, [#allocation4], %s345_s25, %s345_s25, %s346_s26  }
  0x11   :  { %342 = dma.done.wait [#allocation4], 512  }
  0x12   :  { %343 = vsyncadd [#allocation4], 4294966784  ;;  %vm72_vm0 = vcmask 25600   ;;  %v347_v0 = vmov 0.0|0.0   ;;  %v348_v1 = vmov 0.0   ;;  %vm349_vm1 = vmmov 0  }
  0x13   :  { %304 = vmatprep.subr.bf16.mxu0 %v347_v0  ;;  %73 = vst.msk [vmem:[#allocation2] sm:$0x3] %vm72_vm0, %v348_v1  ;;  %299 = vmatprep.subr.mxu1 %v348_v1  ;;  %vm86_vm2 = vcmask 261120   ;;  %v75_v2 = vld [vmem:[#allocation3] sm:$0xff]  ;;  %v76_v3 = vld [vmem:[#allocation3 + $0x8] sm:$0xff]  ;;  %v77_v5 = vld [vmem:[#allocation3 + $0x10] sm:$0xff] }
  0x14   :  { %296 = vmatprep.mubr.msk.f32.mxu0 %vm349_vm1, %v348_v1  ;;  %301 = vmatprep.mubr.msk.f32.mxu1 %vm349_vm1, %v348_v1  ;;  %vm306_vm3 = vmpackc.low %vm86_vm2, %vm86_vm2  ;;  %v305_v4 = vpack.c.bf16 %v76_v3, %v75_v2  ;;  %v78_v6 = vld [vmem:[#allocation3 + $0x18] sm:$0xff] }
  0x15   :  { %v309_v7 = vpack.c.bf16 %v78_v6, %v77_v5  ;;  %v74_v8 = vld [vmem:[%s407_s0] sm:$0x3] }
  0x16   :  { %307 = vmatpush3.bf16.xpose.msk.msra.mxu0 %vm306_vm3, %v305_v4  ;;  %v174_v9 = vld [vmem:[%s410_s3] sm:$0xf] }
  0x17   :  { %308 = vmatprep.subr.bf16.mxu0 %v347_v0  ;;  %300 = vmatpush3.xpose.msk.msra.mxu1 %vm86_vm2, %v174_v9  ;;  %v273_v10 = vld [vmem:[%s409_s2] ss:$0 sm:$0xff] }
  0x1a   :  { %v173_v15 = vld [vmem:[#allocation2] sm:$0x3] }
  0x1e   :  { %311 = vmatpush3.bf16.xpose.msk.msra.mxu0 %vm306_vm3, %v309_v7 }
  0x25   :  { %297 = vmatmul.mubr.msk.f32.vlgmr.msra.gmra.mrb[0].mxu0 %vm86_vm2, %v74_v8 }
  0xf8   :  { %v168_v11 = vpop.f32.mrb[0].mxu0 }
  0xf9   :  { %v169_v12 = vadd.f32 %v273_v10, %v168_v11  ;;  %v298_v13 = vpop.f32.mrb[1].mxu0 }
  0xfb   :  { %318 = vtanh.f32 %v169_v12 }
 0x105   :  { %v319_v14 = vpop.eup %318 }
 0x106   :  { %302 = vmatmul.mubr.msk.f32.vlgmr.msra.gmra.mrb[0].mxu1 %vm86_vm2, %v319_v14 }
 0x1d9   :  { %v247_v16 = vpop.f32.mrb[0].mxu1 }
 0x1da   :  { %v251_v17 = vadd.f32 %v247_v16, %v173_v15  ;;  %v303_v18 = vpop.f32.mrb[1].mxu1 }
 0x1dc   :  { %253 = vst.msk [vmem:[#allocation2] sm:$0x3] %vm72_vm0, %v251_v17 }
 0x1e3   :  { %v257_v19 = vld [vmem:[#allocation2] sm:$0x3] }
 0x1e4   :  { %258 = vst.msk [vmem:[%s411_s4] sm:$0x3] %vm72_vm0, %v257_v19 }
 0x1e5   :  { %263 = vsyncpa [#allocation4], 1 }

</bundles_post_ra>
